<compile_context>
chip_gen: v6e
topology: v6e:2x2x1
jax: 0.10.0
libtpu: 0.0.40
codegen_flags: <defaults>
</compile_context>

<pallas_src>
import math

import numpy as np

import jax
import jax.numpy as jnp
from jax.experimental import pallas as pl
from jax.experimental.pallas import tpu as pltpu


# ---------------------------------------------------------------------------
# Pallas kernel: the whole residual block, fused, `Bb` batch elements per step.
# ---------------------------------------------------------------------------
def residual_kernel(xp_ref, m1_ref, m2_ref, o_ref):
    """out = x + Conv1x1(ReLU(Conv3x3(ReLU(x), pad=1))), row-packed layout.

    xp_ref: (Bb, H+2, W*C)    row-zero-padded input, (width, channel) on lanes
    m1_ref: (3*W*C, W*Ch)     3x3-conv weights, row taps concatenated along K,
                              column taps + padding folded in (bf16)
    m2_ref: (W*Ch, W*C)       1x1-conv weights, block-diagonal over W (bf16)
    o_ref : (Bb, H, W*C)
    """
    H = o_ref.shape[1]
    xp = xp_ref[...]                                   # single load of the slab
    relu_xp = jnp.maximum(xp, 0.0)                     # first ReLU, once, in f32
    # Three shifted row-slices side by side -> one lane-dense (Bb, H, 3*W*C) LHS.
    rows = jnp.concatenate([relu_xp[:, dy:dy + H, :] for dy in range(3)], axis=-1)
    h = jnp.einsum("bhk,kn->bhn", rows.astype(jnp.bfloat16), m1_ref[...],
                   preferred_element_type=jnp.float32)  # 3x3 conv, one matmul
    h = jnp.maximum(h, 0.0)                             # second ReLU (f32)
    y = jnp.einsum("bhk,kn->bhn", h.astype(jnp.bfloat16), m2_ref[...],
                   preferred_element_type=jnp.float32)  # 1x1 conv
    o_ref[...] = (xp[:, 1:1 + H, :] + y).astype(o_ref.dtype)   # residual add


# ---------------------------------------------------------------------------
# One-time weight repacking (host side, at parameter-load time).
# ---------------------------------------------------------------------------
def pack_residual_weights(w1, w2, width):
    """Fold the 3x3 column taps, zero padding and the 1x1 conv into matmul-ready
    bf16 matrices.

    w1: (3, 3, C, Ch) HWIO 3x3-conv weight (bias-free)
    w2: (Ch, C)       1x1-conv weight (bias-free)
    Returns m1: (3*width*C, width*Ch), m2: (width*Ch, width*C), both bf16.
    """
    kh, kw, c, ch = w1.shape
    w1 = np.asarray(w1, np.float32)
    w2 = np.asarray(w2, np.float32)
    k0 = width * c
    m1 = np.zeros((kh * k0, width * ch), np.float32)
    for dy in range(kh):
        for dx in range(kw):
            for x in range(width):
                cin = x + dx - 1          # pad=1: unpadded input column
                if 0 <= cin < width:      # out-of-range taps contribute zero
                    r0 = dy * k0 + cin * c
                    m1[r0:r0 + c, x * ch:(x + 1) * ch] = w1[dy, dx]
    m2 = np.zeros((width * ch, width * c), np.float32)
    for x in range(width):
        m2[x * ch:(x + 1) * ch, x * c:(x + 1) * c] = w2
    return jnp.asarray(m1, jnp.bfloat16), jnp.asarray(m2, jnp.bfloat16)


# ---------------------------------------------------------------------------
# Wrapper: NCHW interface, one fused pallas_call, grid over the batch.
# ---------------------------------------------------------------------------
def residual_forward(x_nchw, m1, m2, *, batch_block=None):
    n, c, h, w = x_nchw.shape
    k0 = w * c
    # Lane-dense layout relies on W*C and W*Ch being multiples of 128.
    assert k0 % 128 == 0 and m2.shape[0] % 128 == 0, (k0, m2.shape)

    if batch_block is None:
        # >= 2 parallel grid steps for N >= 2 (v7x has 2 TensorCores), while
        # batching rows per step for larger N (amortize ~0.35us/step overhead).
        batch_block = n // 2 if (n >= 2 and n % 2 == 0) else 1
    assert n % batch_block == 0
    steps = n // batch_block

    x_nhwc = jnp.transpose(x_nchw, (0, 2, 3, 1))
    # Row-only zero padding (columns are handled in the packed weights); the
    # reshape to the packed row layout is contiguous (free).
    xp = jnp.pad(x_nhwc, ((0, 0), (1, 1), (0, 0), (0, 0))).reshape(n, h + 2, k0)

    out_rows = pl.pallas_call(
        residual_kernel,
        out_shape=jax.ShapeDtypeStruct((n, h, k0), x_nchw.dtype),
        grid=(steps,),
        in_specs=[
            pl.BlockSpec((batch_block, h + 2, k0), lambda i: (i, 0, 0)),
            pl.BlockSpec(m1.shape, lambda i: (0, 0)),   # resident across grid
            pl.BlockSpec(m2.shape, lambda i: (0, 0)),   # resident across grid
        ],
        out_specs=pl.BlockSpec((batch_block, h, k0), lambda i: (i, 0, 0)),
        compiler_params=pltpu.CompilerParams(
            dimension_semantics=("parallel",)),         # v7x: batch over 2 TCs
    )(xp, m1, m2)

    out_nhwc = out_rows.reshape(n, h, w, c)
    return jnp.transpose(out_nhwc, (0, 3, 1, 2))        # back to NCHW


# ---------------------------------------------------------------------------
# Plain-XLA reference of the same module (for a correctness check only).
# ---------------------------------------------------------------------------
def residual_reference(x_nchw, w1, w2):
    c, ch = x_nchw.shape[1], w1.shape[-1]
    h = jax.lax.conv_general_dilated(
        jax.nn.relu(x_nchw), jnp.transpose(w1, (3, 2, 0, 1)),
        window_strides=(1, 1), padding=((1, 1), (1, 1)),
        dimension_numbers=("NCHW", "OIHW", "NCHW"),
        precision=jax.lax.Precision.HIGHEST)
    y = jax.lax.conv_general_dilated(
        jax.nn.relu(h), jnp.transpose(w2, (1, 0)).reshape(c, ch, 1, 1),
        window_strides=(1, 1), padding="VALID",
        dimension_numbers=("NCHW", "OIHW", "NCHW"),
        precision=jax.lax.Precision.HIGHEST)
    return x_nchw + y


# ---------------------------------------------------------------------------
if __name__ == "__main__":
    # Residual(channels=32, num_residual_hidden=16) on a (2, 32, 16, 8) NCHW input.
    N, C, H, W = 2, 32, 16, 8
    CH = 16

    key = jax.random.PRNGKey(0)
    kx, k1, k2 = jax.random.split(key, 3)
    x = jax.random.normal(kx, (N, C, H, W), jnp.float32)      # NCHW, like PyTorch
    # Synthetic weights with PyTorch Conv2d init bounds (torch.manual_seed(14)'s
    # exact values cannot be reproduced from JAX; shapes/semantics match).
    b1 = 1.0 / math.sqrt(C * 3 * 3)
    w1 = jax.random.uniform(k1, (3, 3, C, CH), jnp.float32, -b1, b1)  # HWIO
    b2 = 1.0 / math.sqrt(CH)
    w2 = jax.random.uniform(k2, (CH, C), jnp.float32, -b2, b2)

    m1, m2 = pack_residual_weights(w1, w2, W)   # one-time, load-time repack (bf16)

    out = jax.jit(residual_forward)(x, m1, m2)
    jax.block_until_ready(out)

    ref = residual_reference(x, w1, w2)
    err = float(jnp.max(jnp.abs(out - ref)))
    assert out.shape == (N, C, H, W), out.shape
    assert out.dtype == jnp.float32
    # bf16 matmul operands (f32 accumulation) cap accuracy vs the f32 HIGHEST
    # reference at roughly the 1e-2 level for O(1) activations.
    assert err < 4e-2, f"mismatch vs XLA reference: {err}"
    print("KERNEL_OK")
</pallas_src>

<mosaic_0001>
module attributes {stable_mosaic.version = 11 : i64} {
  func.func @residual_kernel(%arg0: i32, %arg1: memref<1x18x256xf32, #tpu.memory_space<vmem>>, %arg2: memref<768x128xbf16, #tpu.memory_space<vmem>>, %arg3: memref<128x256xbf16, #tpu.memory_space<vmem>>, %arg4: memref<1x16x256xf32, #tpu.memory_space<vmem>>) attributes {dimension_semantics = [#tpu.dimension_semantics<parallel>], iteration_bounds = array<i64: 2>, scalar_prefetch = 0 : i64, scratch_operands = 0 : i64, tpu.core_type = #tpu.core_type<tc>, window_params = [{transform_indices = @transform_0, window_bounds = array<i64: 1, 18, 256>}, {pipeline_mode = #tpu.pipeline_mode<synchronous>, transform_indices = @transform_1, window_bounds = array<i64: 768, 128>}, {pipeline_mode = #tpu.pipeline_mode<synchronous>, transform_indices = @transform_2, window_bounds = array<i64: 128, 256>}, {transform_indices = @transform_3, window_bounds = array<i64: 1, 16, 256>}]} {
    %c0 = arith.constant 0 : index
    %c0_0 = arith.constant 0 : index
    %c0_1 = arith.constant 0 : index
    %0 = vector.load %arg1[%c0, %c0_0, %c0_1] : memref<1x18x256xf32, #tpu.memory_space<vmem>>, vector<1x18x256xf32>
    %cst = arith.constant 0.000000e+00 : f32
    %1 = vector.broadcast %cst : f32 to vector<1x18x256xf32>
    %2 = arith.maximumf %0, %1 : vector<1x18x256xf32>
    %3 = vector.extract_strided_slice %2 {offsets = [0, 0, 0], sizes = [1, 16, 256], strides = [1, 1, 1]} : vector<1x18x256xf32> to vector<1x16x256xf32>
    %4 = vector.extract_strided_slice %2 {offsets = [0, 1, 0], sizes = [1, 16, 256], strides = [1, 1, 1]} : vector<1x18x256xf32> to vector<1x16x256xf32>
    %5 = vector.extract_strided_slice %2 {offsets = [0, 2, 0], sizes = [1, 16, 256], strides = [1, 1, 1]} : vector<1x18x256xf32> to vector<1x16x256xf32>
    %6 = tpu.concatenate %3, %4, %5 in 2 : vector<1x16x256xf32>, vector<1x16x256xf32>, vector<1x16x256xf32> -> vector<1x16x768xf32>
    %7 = arith.truncf %6 : vector<1x16x768xf32> to vector<1x16x768xbf16>
    %c0_2 = arith.constant 0 : index
    %c0_3 = arith.constant 0 : index
    %8 = vector.load %arg2[%c0_2, %c0_3] : memref<768x128xbf16, #tpu.memory_space<vmem>>, vector<768x128xbf16>
    "tpu.trace_start"() <{level = 10 : i32, message = "bhk,kn->bhn"}> : () -> ()
    %cst_4 = arith.constant dense<0.000000e+00> : vector<1x16x128xf32>
    %9 = tpu.matmul %7, %8, %cst_4 {dimension_numbers = #tpu.dot_dimension_numbers<[2], [0], [0, 1], [1], [0, 0, 0, 1, 1, 1], [], []>} : vector<1x16x768xbf16>, vector<768x128xbf16>, vector<1x16x128xf32> -> vector<1x16x128xf32>
    "tpu.trace_stop"() : () -> ()
    %cst_5 = arith.constant 0.000000e+00 : f32
    %10 = vector.broadcast %cst_5 : f32 to vector<1x16x128xf32>
    %11 = arith.maximumf %9, %10 : vector<1x16x128xf32>
    %12 = arith.truncf %11 : vector<1x16x128xf32> to vector<1x16x128xbf16>
    %c0_6 = arith.constant 0 : index
    %c0_7 = arith.constant 0 : index
    %13 = vector.load %arg3[%c0_6, %c0_7] : memref<128x256xbf16, #tpu.memory_space<vmem>>, vector<128x256xbf16>
    "tpu.trace_start"() <{level = 10 : i32, message = "bhk,kn->bhn"}> : () -> ()
    %cst_8 = arith.constant dense<0.000000e+00> : vector<1x16x256xf32>
    %14 = tpu.matmul %12, %13, %cst_8 {dimension_numbers = #tpu.dot_dimension_numbers<[2], [0], [0, 1], [1], [0, 0, 0, 1, 1, 1], [], []>} : vector<1x16x128xbf16>, vector<128x256xbf16>, vector<1x16x256xf32> -> vector<1x16x256xf32>
    "tpu.trace_stop"() : () -> ()
    %15 = vector.extract_strided_slice %0 {offsets = [0, 1, 0], sizes = [1, 16, 256], strides = [1, 1, 1]} : vector<1x18x256xf32> to vector<1x16x256xf32>
    %16 = arith.addf %15, %14 : vector<1x16x256xf32>
    %c0_9 = arith.constant 0 : index
    %c0_10 = arith.constant 0 : index
    %c0_11 = arith.constant 0 : index
    %17 = vector.load %arg4[%c0_9, %c0_10, %c0_11] : memref<1x16x256xf32, #tpu.memory_space<vmem>>, vector<1x16x256xf32>
    tpu.vector_store %arg4[%c0_9, %c0_10, %c0_11], %16 {strides = array<i32>} : memref<1x16x256xf32, #tpu.memory_space<vmem>>, vector<1x16x256xf32>,
    return
  }
  func.func @transform_0(%arg0: i32) -> (i32, i32, i32) {
    %c0_i32 = arith.constant 0 : i32
    %c0_i32_0 = arith.constant 0 : i32
    %c0_i32_1 = arith.constant 0 : i32
    return %arg0, %c0_i32, %c0_i32_0 : i32, i32, i32
  }
  func.func @transform_1(%arg0: i32) -> (i32, i32) {
    %c0_i32 = arith.constant 0 : i32
    %c0_i32_0 = arith.constant 0 : i32
    %c0_i32_1 = arith.constant 0 : i32
    return %c0_i32, %c0_i32_0 : i32, i32
  }
  func.func @transform_2(%arg0: i32) -> (i32, i32) {
    %c0_i32 = arith.constant 0 : i32
    %c0_i32_0 = arith.constant 0 : i32
    %c0_i32_1 = arith.constant 0 : i32
    return %c0_i32, %c0_i32_0 : i32, i32
  }
  func.func @transform_3(%arg0: i32) -> (i32, i32, i32) {
    %c0_i32 = arith.constant 0 : i32
    %c0_i32_0 = arith.constant 0 : i32
    %c0_i32_1 = arith.constant 0 : i32
    return %arg0, %c0_i32, %c0_i32_0 : i32, i32, i32
  }
}

</mosaic_0001>

<bundles_post_ra>
// kernel: residual_forward.1
= control target key start
LH: loop header
LB: loop body
LE: loop exit
PB: predicated region body
PF: predicated region fallthrough
CT: control target
= control target key end

     0   :  { %s1229_s12 = smov 0   ;;  %s1492_s0 = inlined_call_operand.vmem [shape: f32[2,18,256], index: 0, kind: input, shape index: {}]   ;;  %s1493_s1 = inlined_call_operand.vmem [shape: bf16[768,128], index: 1, kind: input, shape index: {}]   ;;  %s1494_s2 = inlined_call_operand.vmem [shape: bf16[128,256], index: 2, kind: input, shape index: {}]   ;;  %s1495_s3 = inlined_call_operand.vmem [shape: f32[2,16,256], index: 3, kind: output, shape index: {}]  }
   0x1 LB: > { %s977_s13 = sadd.s32 4294967295, %s1206_s12   ;;  %p981_p0 = scmp.ge.s32.totalorder %s1206_s12, 1  ;;  %s1206_s12 = sphi %s1229_s12, %s13_s12  }
   0x2   : > { %p137_p1 = scmp.lt.s32.totalorder %s1206_s12, 3 }
   0x4   : > { %p138_p2 = pnand %p981_p0, %p137_p1 }
   0x5   : > { %p161_p3 = scmp.lt.s32.totalorder (!%p138_p2), %s977_s13, 1 }
   0x6   : > { %141 = sbr.rel (%p138_p2) target bundleno = 492 (0x1ec), region = 32 }
   0xb   : > { %v1128_v0 = vld [vmem:[%s1493_s1 + $0x78] sm:$0xff]   ;;  %v1132_v4 = vld [vmem:[%s1493_s1 + $0x70] sm:$0xff]   ;;  %v1136_v8 = vld [vmem:[%s1493_s1 + $0x68] sm:$0xff]   ;;  %s1497_s13 = smov (!%p161_p3, %s977_s13), 1  ;;  %vm190_vm0 = vcmask 1046528   ;;  %vm205_vm1 = vcmask 1045504  }
   0xc   : > { %v1129_v1 = vld [vmem:[%s1493_s1 + $0xf8] sm:$0xff]   ;;  %1052 = vmatprep.subr.bf16.mxu0 %v1128_v0  ;;  %v1133_v5 = vld [vmem:[%s1493_s1 + $0xf0] sm:$0xff]   ;;  %v1137_v9 = vld [vmem:[%s1493_s1 + $0xe8] sm:$0xff]   ;;  %s1118_s16 = smul.u32 48, %s1497_s13  ;;  %vm879_vm2 = vcmask 1040384   ;;  %s1051_s21 = sshll.u32 %s1497_s13, 5 }
   0xd   : > { %v1130_v2 = vld [vmem:[%s1493_s1 + $0x38] sm:$0xff]   ;;  %1074 = vmatprep.subr.bf16.mxu1 %v1129_v1  ;;  %v1134_v6 = vld [vmem:[%s1493_s1 + $0x30] sm:$0xff]   ;;  %v1138_v10 = vld [vmem:[%s1493_s1 + $0x28] sm:$0xff]   ;;  %s170_s24 = scalar_lea.vmem %s1495_s3, %s1051_s21 }
   0xe   : > { %v1131_v3 = vld [vmem:[%s1493_s1 + $0xb8] sm:$0xff]   ;;  %1053 = vmatpush3.bf16.msra.mxu0 %v1130_v2  ;;  %v1135_v7 = vld [vmem:[%s1493_s1 + $0xb0] sm:$0xff]   ;;  %v1139_v11 = vld [vmem:[%s1493_s1 + $0xa8] sm:$0xff]   ;;  %s165_s27 = scalar_lea.vmem %s1492_s0, %s1118_s16 }
   0xf   : > { %1075 = vmatpush3.bf16.msra.mxu1 %v1131_v3  ;;  %1054 = vmatprep.subr.bf16.mxu0 %v1132_v4  ;;  %v1140_v12 = vld [vmem:[%s1493_s1 + $0x60] sm:$0xff]   ;;  %v1144_v16 = vld [vmem:[%s1493_s1 + $0x58] sm:$0xff]   ;;  %v1148_v20 = vld [vmem:[%s1493_s1 + $0x50] sm:$0xff]  }
  0x10   : > { %1076 = vmatprep.subr.bf16.mxu1 %v1133_v5  ;;  %v1141_v13 = vld [vmem:[%s1493_s1 + $0xe0] sm:$0xff]   ;;  %v1145_v17 = vld [vmem:[%s1493_s1 + $0xd8] sm:$0xff]   ;;  %v1149_v21 = vld [vmem:[%s1493_s1 + $0xd0] sm:$0xff]  }
  0x11   : > { %v1142_v14 = vld [vmem:[%s1493_s1 + $0x20] sm:$0xff]   ;;  %v1146_v18 = vld [vmem:[%s1493_s1 + $0x18] sm:$0xff]   ;;  %v1150_v22 = vld [vmem:[%s1493_s1 + $0x10] sm:$0xff]  }
  0x12   : > { %1055 = vmatpush3.bf16.msra.mxu0 %v1134_v6  ;;  %v1143_v15 = vld [vmem:[%s1493_s1 + $0xa0] sm:$0xff]   ;;  %v1147_v19 = vld [vmem:[%s1493_s1 + $0x98] sm:$0xff]   ;;  %v1151_v23 = vld [vmem:[%s1493_s1 + $0x90] sm:$0xff]  }
  0x13   : > { %1077 = vmatpush3.bf16.msra.mxu1 %v1135_v7  ;;  %1056 = vmatprep.subr.bf16.mxu0 %v1136_v8  ;;  %v1152_v24 = vld [vmem:[%s1493_s1 + $0x48] sm:$0xff]   ;;  %v1156_v28 = vld [vmem:[%s1493_s1 + $0x40] sm:$0xff]   ;;  %v1345_v33 = vld [vmem:[%s165_s27 + $0x18] sm:$0xff] }
  0x14   : > { %1078 = vmatprep.subr.bf16.mxu1 %v1137_v9  ;;  %v1153_v25 = vld [vmem:[%s1493_s1 + $0xc8] sm:$0xff]   ;;  %v1157_v29 = vld [vmem:[%s1493_s1 + $0xc0] sm:$0xff]   ;;  %v181_v36 = vmax.f32 %v1345_v33, 0.0  ;;  %v1354_v39 = vld [vmem:[%s165_s27 + $0x10] sm:$0xff] }
  0x15   : > { %v1154_v26 = vld [vmem:[%s1493_s1 + $0x8] sm:$0xff]   ;;  %v1158_v30 = vld [vmem:[%s1493_s1] sm:$0xff]   ;;  %v1160_v40 = vld [vmem:[%s1493_s1 + $0x178] sm:$0xff]   ;;  %v1363_v42 = vmax.f32 %v1354_v39, 0.0 }
  0x16   : > { %1057 = vmatpush3.bf16.msra.mxu0 %v1138_v10  ;;  %v1155_v27 = vld [vmem:[%s1493_s1 + $0x88] sm:$0xff]   ;;  %v1159_v31 = vld [vmem:[%s1493_s1 + $0x80] sm:$0xff]   ;;  %v210_v45 = vrot.slane %v181_v36, 2  ;;  %v1161_v48 = vld [vmem:[%s1493_s1 + $0x138] sm:$0xff]   ;;  %v195_v49 = vrot.slane %v181_v36, 1 }
  0x17   : > { %1079 = vmatpush3.bf16.msra.mxu1 %v1139_v11  ;;  %1058 = vmatprep.subr.bf16.mxu0 %v1140_v12  ;;  %v1343_v32 = vld [vmem:[%s165_s27 + $0x8] sm:$0xff]  ;;  %v1352_v38 = vld [vmem:[%s165_s27] sm:$0xff]  ;;  %v1162_v53 = vld [vmem:[%s1493_s1 + $0x170] sm:$0xff]   ;;  %v192_v55 = vrot.slane %v1363_v42, 1 }
  0x18   : > { %1080 = vmatprep.subr.bf16.mxu1 %v1141_v13  ;;  %v1347_v34 = vld [vmem:[%s165_s27 + $0x28] sm:$0x3]  ;;  %v179_v35 = vmax.f32 %v1343_v32, 0.0  ;;  %v1360_v41 = vmax.f32 %v1352_v38, 0.0  ;;  %v1365_v43 = vld [vmem:[%s165_s27 + $0x20] sm:$0x3] }
  0x19   : > { %v183_v37 = vmax.f32 %v1347_v34, 0.0  ;;  %v182_v52 = vmax.f32 %v1365_v43, 0.0  ;;  %v1163_v59 = vld [vmem:[%s1493_s1 + $0x130] sm:$0xff]   ;;  %v1164_v63 = vld [vmem:[%s1493_s1 + $0x168] sm:$0xff]   ;;  %v1166_v6 = vld [vmem:[%s1493_s1 + $0x160] sm:$0xff]  }
  0x1a   : > { %1059 = vmatpush3.bf16.msra.mxu0 %v1142_v14  ;;  %v209_v44 = vrot.slane %v179_v35, 2  ;;  %v221_v46 = vpack.c.bf16 %v181_v36, %v179_v35  ;;  %v194_v47 = vrot.slane %v179_v35, 1  ;;  %v220_v51 = vpack.c.bf16 %v1363_v42, %v1360_v41  ;;  %v1165_v4 = vld [vmem:[%s1493_s1 + $0x128] sm:$0xff]   ;;  %v1167_v7 = vld [vmem:[%s1493_s1 + $0x120] sm:$0xff]   ;;  %v1168_v8 = vld [vmem:[%s1493_s1 + $0x158] sm:$0xff]  }
  0x1b   : > { %1081 = vmatpush3.bf16.msra.mxu1 %v1143_v15  ;;  %1060 = vmatprep.subr.bf16.mxu0 %v1144_v16  ;;  %v199_v50 = vrot.slane %v183_v37, 1  ;;  %v191_v54 = vrot.slane %v1360_v41, 1  ;;  %v197_v58 = vrot.slane %v182_v52, 1  ;;  %v214_v1 = vrot.slane %v183_v37, 2  ;;  %v1169_v9 = vld [vmem:[%s1493_s1 + $0x118] sm:$0xff]   ;;  %v1170_v10 = vld [vmem:[%s1493_s1 + $0x150] sm:$0xff]  }
  0x1c   : > { %1082 = vmatprep.subr.bf16.mxu1 %v1145_v17  ;;  %642 = vmatprep.mubr.bf16.mxu0 %v221_v46  ;;  %v196_v56 = vsel %vm190_vm0, %v194_v47, %v195_v49  ;;  %v211_v0 = vsel %vm205_vm1, %v209_v44, %v210_v45  ;;  %v1171_v11 = vld [vmem:[%s1493_s1 + $0x110] sm:$0xff]   ;;  %v1172_v12 = vld [vmem:[%s1493_s1 + $0x148] sm:$0xff]   ;;  %v206_v14 = vrot.slane %v1360_v41, 2  ;;  %v207_v15 = vrot.slane %v1363_v42, 2  ;;  %v1174_v17 = vld [vmem:[%s1493_s1 + $0x140] sm:$0xff]  }
  0x1d   : > { %v200_v57 = vsel %vm190_vm0, %v195_v49, %v199_v50  ;;  %v193_v61 = vsel %vm190_vm0, %v191_v54, %v192_v55  ;;  %v198_v62 = vsel %vm190_vm0, %v192_v55, %v197_v58  ;;  %v215_v3 = vsel %vm205_vm1, %v210_v45, %v214_v1  ;;  %v1173_v13 = vld [vmem:[%s1493_s1 + $0x108] sm:$0xff]   ;;  %v1196_v37 = vld [vmem:[%s1494_s2 + $0x14] ss:$8 sps:$4 sm:$0xff]  }
  0x1e   : > { %1061 = vmatpush3.bf16.msra.mxu0 %v1146_v18  ;;  %v223_v60 = vpack.c.bf16 %v200_v57, %v196_v56  ;;  %v222_v2 = vpack.c.bf16 %v198_v62, %v193_v61  ;;  %v225_v5 = vpack.c.bf16 %v215_v3, %v211_v0  ;;  %v212_v16 = vrot.slane %v182_v52, 2  ;;  %v1175_v18 = vld [vmem:[%s1493_s1 + $0x100] sm:$0xff]  }
  0x1f   : > { %1083 = vmatpush3.bf16.msra.mxu1 %v1147_v19  ;;  %1062 = vmatprep.subr.bf16.mxu0 %v1148_v20  ;;  %v208_v19 = vsel %vm205_vm1, %v206_v14, %v207_v15  ;;  %v1193_v35 = vld [vmem:[%s1494_s2 + $0x24] ss:$8 sps:$4 sm:$0xff]   ;;  %v1191_v36 = vld [vmem:[%s1494_s2 + $0x20] ss:$8 sps:$4 sm:$0xff]   ;;  %v1208_v44 = vmov 0  }
  0x20   : > { %1084 = vmatprep.subr.bf16.mxu1 %v1149_v21  ;;  %683 = vmatprep.mubr.bf16.mxu1 %v223_v60  ;;  %v213_v20 = vsel %vm205_vm1, %v207_v15, %v212_v16  ;;  %v1197_v41 = vld [vmem:[%s1494_s2] ss:$8 sps:$4 sm:$0xff]   ;;  %v1199_v42 = vld [vmem:[%s1494_s2 + $0x4] ss:$8 sps:$4 sm:$0xff]  }
  0x21   : > { %v224_v21 = vpack.c.bf16 %v213_v20, %v208_v19 }
  0x22   : > { %1063 = vmatpush3.bf16.msra.mxu0 %v1150_v22  ;;  %v1176_v22 = vld [vmem:[%s1494_s2 + $0x70] ss:$8 sps:$4 sm:$0xff]  }
  0x23   : > { %1085 = vmatpush3.bf16.msra.mxu1 %v1151_v23  ;;  %1064 = vmatprep.subr.bf16.mxu0 %v1152_v24  ;;  %v1178_v23 = vld [vmem:[%s1494_s2 + $0x74] ss:$8 sps:$4 sm:$0xff]   ;;  %v1181_v24 = vld [vmem:[%s1494_s2 + $0x64] ss:$8 sps:$4 sm:$0xff]  }
  0x24   : > { %1086 = vmatprep.subr.bf16.mxu1 %v1153_v25  ;;  %v1179_v25 = vld [vmem:[%s1494_s2 + $0x60] ss:$8 sps:$4 sm:$0xff]  }
  0x26   : > { %1065 = vmatpush3.bf16.msra.mxu0 %v1154_v26  ;;  %v1184_v26 = vld [vmem:[%s1494_s2 + $0x54] ss:$8 sps:$4 sm:$0xff]  }
  0x27   : > { %1087 = vmatpush3.bf16.msra.mxu1 %v1155_v27  ;;  %1066 = vmatprep.subr.bf16.mxu0 %v1156_v28  ;;  %v1182_v27 = vld [vmem:[%s1494_s2 + $0x50] ss:$8 sps:$4 sm:$0xff]   ;;  %v1187_v28 = vld [vmem:[%s1494_s2 + $0x44] ss:$8 sps:$4 sm:$0xff]  }
  0x28   : > { %1088 = vmatprep.subr.bf16.mxu1 %v1157_v29  ;;  %v1185_v29 = vld [vmem:[%s1494_s2 + $0x40] ss:$8 sps:$4 sm:$0xff]  }
  0x2a   : > { %1067 = vmatpush3.bf16.msra.mxu0 %v1158_v30  ;;  %v1190_v30 = vld [vmem:[%s1494_s2 + $0x34] ss:$8 sps:$4 sm:$0xff]  }
  0x2b   : > { %1089 = vmatpush3.bf16.msra.mxu1 %v1159_v31  ;;  %1096 = vmatprep.subr.bf16.mxu0 %v1160_v40  ;;  %v1188_v31 = vld [vmem:[%s1494_s2 + $0x30] ss:$8 sps:$4 sm:$0xff]  }
  0x2c   : > { %832 = vmatprep.subr.bf16.mxu1 %v1178_v23  ;;  %v1194_v40 = vld [vmem:[%s1494_s2 + $0x10] ss:$8 sps:$4 sm:$0xff]  }
  0x2d   : > { %643 = vmatmul.mubr.bf16.vlgmr.msra.gmra.mxu0 %v220_v51 }
  0x2e   : > { %1097 = vmatpush3.bf16.msra.mxu0 %v1161_v48  ;;  %684 = vmatmul.mubr.bf16.vlgmr.msra.gmra.mxu1 %v222_v2 }
  0x2f   : > { %1098 = vmatprep.subr.bf16.mxu0 %v1162_v53  ;;  %724 = vmatprep.mubr.bf16.mxu0 %v225_v5 }
  0x30   : > { %833 = vmatpush1.bf16.msra.mxu1 %v1176_v22  ;;  %864 = vmatprep.mubr.bf16.mxu1 %v1208_v44 }
  0x31   : > { %834 = vmatprep.subr.bf16.mxu1 %v1181_v24 }
  0x32   : > { %1099 = vmatpush3.bf16.msra.mxu0 %v1163_v59 }
  0x33   : > { %1100 = vmatprep.subr.bf16.mxu0 %v1164_v63 }
  0x34   : > { %835 = vmatpush1.bf16.msra.mxu1 %v1179_v25 }
  0x35   : > { %836 = vmatprep.subr.bf16.mxu1 %v1184_v26 }
  0x36   : > { %1101 = vmatpush3.bf16.msra.mxu0 %v1165_v4 }
  0x37   : > { %1102 = vmatprep.subr.bf16.mxu0 %v1166_v6 }
  0x38   : > { %837 = vmatpush1.bf16.msra.mxu1 %v1182_v27 }
  0x39   : > { %838 = vmatprep.subr.bf16.mxu1 %v1187_v28 }
  0x3a   : > { %1103 = vmatpush3.bf16.msra.mxu0 %v1167_v7 }
  0x3b   : > { %1104 = vmatprep.subr.bf16.mxu0 %v1168_v8 }
  0x3c   : > { %839 = vmatpush1.bf16.msra.mxu1 %v1185_v29 }
  0x3d   : > { %840 = vmatprep.subr.bf16.mxu1 %v1190_v30 }
  0x3e   : > { %1105 = vmatpush3.bf16.msra.mxu0 %v1169_v9 }
  0x3f   : > { %1106 = vmatprep.subr.bf16.mxu0 %v1170_v10 }
  0x40   : > { %841 = vmatpush1.bf16.msra.mxu1 %v1188_v31 }
  0x41   : > { %842 = vmatprep.subr.bf16.mxu1 %v1193_v35 }
  0x42   : > { %1107 = vmatpush3.bf16.msra.mxu0 %v1171_v11 }
  0x43   : > { %1108 = vmatprep.subr.bf16.mxu0 %v1172_v12 }
  0x44   : > { %843 = vmatpush1.bf16.msra.mxu1 %v1191_v36 }
  0x45   : > { %844 = vmatprep.subr.bf16.mxu1 %v1196_v37 }
  0x46   : > { %1109 = vmatpush3.bf16.msra.mxu0 %v1173_v13 }
  0x47   : > { %1110 = vmatprep.subr.bf16.mxu0 %v1174_v17 }
  0x48   : > { %845 = vmatpush1.bf16.msra.mxu1 %v1194_v40 }
  0x49   : > { %846 = vmatprep.subr.bf16.mxu1 %v1199_v42 }
  0x4a   : > { %1111 = vmatpush3.bf16.msra.mxu0 %v1175_v18 }
  0x4c   : > { %847 = vmatpush1.bf16.msra.mxu1 %v1197_v41 }
  0x4d   : > { %725 = vmatmul.mubr.bf16.vlgmr.msra.gmra.mxu0 %v224_v21 }
  0xed   : > { %v1068_v45 = vpop.f32.mrf.mxu0 }
  0xee   : > { %v1090_v46 = vpop.f32.mrf.mxu1 }
  0xef   : > { %v1069_v47 = vpop.f32.mrf.mxu0 }
  0xf0   : > { %v1091_v48 = vpop.f32.mrf.mxu1  ;;  %v1070_v54 = vadd.f32 %v1069_v47, %v1068_v45 }
  0xf1   : > { %v1071_v49 = vpop.f32.mrf.mxu0  ;;  %v1092_v55 = vadd.f32 %v1091_v48, %v1090_v46 }
  0xf2   : > { %v1093_v50 = vpop.f32.mrf.mxu1 }
  0xf3   : > { %v1072_v51 = vpop.f32.mrf.mxu0  ;;  %v686_v61 = vadd.f32 %v1092_v55, %v1070_v54 }
  0xf4   : > { %v1094_v52 = vpop.f32.mrf.mxu1  ;;  %v1073_v57 = vadd.f32 %v1072_v51, %v1071_v49 }
  0xf5   : > { %v1095_v58 = vadd.f32 %v1094_v52, %v1093_v50 }
  0xf7   : > { %v689_v63 = vadd.f32 %v1095_v58, %v1073_v57 }
 0x10d   : > { %v1112_v53 = vpop.f32.mrf.mxu0 }
 0x10f   : > { %v1113_v56 = vpop.f32.mrf.mxu0 }
 0x110   : > { %v1114_v59 = vadd.f32 %v1113_v56, %v1112_v53 }
 0x111   : > { %v1115_v60 = vpop.f32.mrf.mxu0 }
 0x112   : > { %v727_v0 = vadd.f32 %v1114_v59, %v686_v61 }
 0x113   : > { %v1116_v62 = vpop.f32.mrf.mxu0 }
 0x114   : > { %v1117_v1 = vadd.f32 %v1116_v62, %v1115_v60  ;;  %v733_v3 = vmax.f32 %v727_v0, 0.0 }
 0x116   : > { %v730_v2 = vadd.f32 %v1117_v1, %v689_v63 }
 0x118   : > { %v734_v4 = vmax.f32 %v730_v2, 0.0 }
 0x11a   : > { %v735_v5 = vpack.c.bf16 %v734_v4, %v733_v3 }
 0x11c   : > { %865 = vmatmul.mubr.bf16.vlgmr.msra.gmra.mxu1 %v735_v5 }
 0x1dc   : > { %v866_v6 = vpop.f32.mrf.mxu1 }
 0x1dd   : > { %v880_v7 = vrot.slane %v866_v6, 7 }
 0x1de   : > { %v868_v8 = vpop.f32.mrf.mxu1 }
 0x1df   : > { %v881_v9 = vrot.slane %v868_v8, 7  ;;  %v892_v12 = vadd.f32 %v880_v7, %v1352_v38 }
 0x1e0   : > { %v870_v10 = vpop.f32.mrf.mxu1 }
 0x1e1   : > { %v882_v11 = vrot.slane %v870_v10, 7  ;;  %v893_v17 = vadd.f32 %v881_v9, %v1343_v32  ;;  %v904_v22 = vrot.slane %v892_v12, 1 }
 0x1e2   : > { %v872_v13 = vpop.f32.mrf.mxu1 }
 0x1e3   : > { %v883_v14 = vsel %vm879_vm2, %v880_v7, %v882_v11  ;;  %v896_v15 = vadd.f32 %v882_v11, %v1365_v43  ;;  %v884_v16 = vrot.slane %v872_v13, 7  ;;  %v907_v25 = vrot.slane %v893_v17, 1 }
 0x1e4   : > { %v894_v18 = vadd.f32 %v883_v14, %v1354_v39 }
 0x1e5   : > { %v910_v19 = vrot.slane %v896_v15, 1  ;;  %v885_v20 = vsel %vm879_vm2, %v881_v9, %v884_v16  ;;  %v897_v21 = vadd.f32 %v884_v16, %v1347_v34 }
 0x1e6   : > { %v905_v38 = vrot.slane %v894_v18, 1  ;;  %v895_v23 = vadd.f32 %v885_v20, %v1345_v33 }
 0x1e7   : > { %v912_v24 = vrot.slane %v897_v21, 1 }
 0x1e8   : > { %v906_v43 = vsel %vm190_vm0, %v904_v22, %v905_v38  ;;  %v911_v32 = vsel %vm190_vm0, %v905_v38, %v910_v19  ;;  %v908_v26 = vrot.slane %v895_v23, 1 }
 0x1e9   : > { %918 = vst [vmem:[%s170_s24] sm:$0xff] %v906_v43  ;;  %920 = vst [vmem:[%s170_s24 + $0x10] sm:$0xff] %v911_v32 }
 0x1ea   : > { %v909_v39 = vsel %vm190_vm0, %v907_v25, %v908_v26  ;;  %v913_v34 = vsel %vm190_vm0, %v908_v26, %v912_v24 }
 0x1eb   : > { %919 = vst [vmem:[%s170_s24 + $0x8] sm:$0xff] %v909_v39  ;;  %921 = vst [vmem:[%s170_s24 + $0x18] sm:$0xff] %v913_v34 }
 0x1ec PF: > { %s13_s12 = sadd.s32 1, %s1206_s12  }
 0x1ed   : > { %p10_p4 = scmp.ge.s32.totalorder %s13_s12, 4  }
 0x1ef   :  { %12 = sbr.rel (!%p10_p4) target bundleno = 1 (0x1), region = 62 }

</bundles_post_ra>
